<compile_context>
chip_gen: v5e
topology: v5e:2x2
jax: 0.10.0
libtpu: 0.0.40
codegen_flags: <defaults>
</compile_context>

<pallas_src>
import functools

import numpy as np
import jax
import jax.numpy as jnp
from jax.experimental import pallas as pl
from jax.experimental.pallas import tpu as pltpu


def _inception_kernel(x_ref, w_ref, b_ref, o_ref):
    # x_ref: (NB*H, 5*Wp*Cin)   K-fused, lane-dense activations for NB images
    # w_ref: (5*Wp*Cin, TN)     banded fused weights (all taps, all 3 branches)
    # b_ref: (1, TN)            bias row (tiled [b1, b3, b5] per output column)
    # o_ref: (NB*H, TN)         TN % 128 == 0 -> unmasked stores
    o_ref[...] = (jnp.dot(x_ref[...], w_ref[...],
                          preferred_element_type=jnp.float32)
                  + b_ref[...]).astype(o_ref.dtype)


def _pack_inception_weights(params, W):
    """Host-side fusion of (w1,b1,w3,b3,w5,b5) into a K-fused banded matrix.

    Returns:
      band_flat: (5*Wp*Cin, Nout_pad) with row index ty*Wp*Cin + wpos*Cin + c
                 and column index w*3*Cout + branch*Cout + co
                 (branch 0 = 1x1, 1 = 3x3, 2 = 5x5 -> matches torch.cat order).
      bias:      (1, Nout_pad)
    """
    w1, b1, w3, b3, w5, b5 = params
    Cin, Cout = w5.shape[2], w5.shape[3]
    Wp = W + 4
    C3 = 3 * Cout
    Nout = W * C3
    Nout_pad = ((Nout + 127) // 128) * 128
    K5 = 5 * Wp * Cin

    w1n = np.asarray(w1, np.float32)
    w3n = np.asarray(w3, np.float32)
    w5n = np.asarray(w5, np.float32)

    band = np.zeros((5, Wp * Cin, Nout_pad), np.float32)
    for w in range(W):
        col = w * C3
        # 1x1 branch (pad=0): single tap at frame position (2, 2).
        band[2, (w + 2) * Cin:(w + 3) * Cin, col:col + Cout] += w1n[0, 0]
        # 3x3 branch (pad=1): taps at frame positions (1..3, 1..3).
        for i in range(3):
            for j in range(3):
                band[i + 1, (w + 1 + j) * Cin:(w + 2 + j) * Cin,
                     col + Cout:col + 2 * Cout] += w3n[i, j]
        # 5x5 branch (pad=2): taps at frame positions (0..4, 0..4).
        for i in range(5):
            for j in range(5):
                band[i, (w + j) * Cin:(w + 1 + j) * Cin,
                     col + 2 * Cout:col + 3 * Cout] += w5n[i, j]

    band_flat = band.reshape(K5, Nout_pad)   # ty-major along K (matches LHS stack)

    bias = np.zeros((1, Nout_pad), np.float32)
    brow = np.concatenate([np.asarray(b1, np.float32)[0],
                           np.asarray(b3, np.float32)[0],
                           np.asarray(b5, np.float32)[0]])
    bias[0, :Nout] = np.tile(brow, W)
    return jnp.asarray(band_flat), jnp.asarray(bias), Nout, Nout_pad


def _pick_batch_block(n, h):
    """Largest divisor NB of n with NB*h <= 256 rows per MXU pass (M)."""
    nb = 1
    for d in range(1, n + 1):
        if n % d == 0 and d * h <= 256:
            nb = d
    if (nb * h) % 8 != 0:      # block sublane dim must be a multiple of 8
        nb = n                 # (or the full array extent)
    return nb


def _pick_n_tile(nout_pad, k5, budget_bytes=4 << 20):
    """TN: multiple of 128 dividing nout_pad, weight tile <= budget (per buffer)."""
    max_tn = max(128, (budget_bytes // (k5 * 4)) // 128 * 128)
    if nout_pad <= max_tn:
        return nout_pad
    tn = (max_tn // 128) * 128
    while tn > 128 and nout_pad % tn != 0:
        tn -= 128
    return max(tn, 128)


@functools.partial(jax.jit, static_argnames=("Cout", "nb", "tn"))
def _inception_jit(x_nchw, band_flat, bias_row, *, Cout, nb, tn):
    N, Cin, H, W = x_nchw.shape
    Hp, Wp = H + 4, W + 4
    K5, Nout_pad = band_flat.shape
    Nout = W * 3 * Cout

    # Glue (fused under this jit): NCHW -> NHWC, zero-pad spatial by 2 (covers
    # the 5x5 halo), fold (W, Cin) onto lanes, stack the 5 vertical taps along
    # K, and merge (N, H) -> rows so the kernel needs no in-kernel reshapes.
    x_nhwc = jnp.transpose(x_nchw, (0, 2, 3, 1))
    x_pad = jnp.pad(x_nhwc, ((0, 0), (2, 2), (2, 2), (0, 0)))
    x2d = x_pad.reshape(N, Hp, Wp * Cin)
    x_stack = jnp.concatenate([x2d[:, ty:ty + H, :] for ty in range(5)], axis=-1)
    x_flat = x_stack.reshape(N * H, K5)

    grid = (N // nb, Nout_pad // tn)

    out = pl.pallas_call(
        _inception_kernel,
        out_shape=jax.ShapeDtypeStruct((N * H, Nout_pad), x_nchw.dtype),
        grid_spec=pltpu.PrefetchScalarGridSpec(
            num_scalar_prefetch=0,
            grid=grid,
            in_specs=[
                # LHS block is invariant along the Nout-tile axis -> no re-DMA.
                pl.BlockSpec((nb * H, K5), lambda i, j: (i, 0)),
                pl.BlockSpec((K5, tn), lambda i, j: (0, j)),
                pl.BlockSpec((1, tn), lambda i, j: (0, j)),
            ],
            out_specs=pl.BlockSpec((nb * H, tn), lambda i, j: (i, j)),
        ),
        compiler_params=pltpu.CompilerParams(
            dimension_semantics=("parallel", "parallel")),
    )(x_flat, band_flat, bias_row)

    # Strip lane padding, unfold (W, 3*Cout), back to NCHW to match
    # torch.cat([conv1x1, conv3x3, conv5x5], dim=1).
    out = out[:, :Nout].reshape(N, H, W, 3 * Cout)
    return jnp.transpose(out, (0, 3, 1, 2))


def inception_forward(x_nchw, params):
    """x_nchw: (N, Cin, H, W) float32. Returns (N, 3*Cout, H, W)."""
    N, Cin, H, W = x_nchw.shape
    Cout = params[0].shape[-1]

    band_flat, bias_row, _, Nout_pad = _pack_inception_weights(params, W)
    K5 = band_flat.shape[0]

    nb = _pick_batch_block(N, H)
    tn = _pick_n_tile(Nout_pad, K5)
    return _inception_jit(x_nchw, band_flat, bias_row, Cout=Cout, nb=nb, tn=tn)


def _reference_forward(x_nchw, params):
    """Pure-JAX reference using lax.conv_general_dilated (matches PyTorch Conv2d)."""
    w1, b1, w3, b3, w5, b5 = params

    def conv(x, w_hwio, b, pad):
        y = jax.lax.conv_general_dilated(
            x, w_hwio, window_strides=(1, 1),
            padding=((pad, pad), (pad, pad)),
            dimension_numbers=("NCHW", "HWIO", "NCHW"))
        return y + b.reshape(1, -1, 1, 1)

    y1 = conv(x_nchw, w1, b1[0], 0)
    y3 = conv(x_nchw, w3, b3[0], 1)
    y5 = conv(x_nchw, w5, b5[0], 2)
    return jnp.concatenate([y1, y3, y5], axis=1)


def init_params(key, in_channels, out_channels):
    ks = jax.random.split(key, 6)
    scale = 0.1
    w1 = scale * jax.random.normal(ks[0], (1, 1, in_channels, out_channels), jnp.float32)
    b1 = scale * jax.random.normal(ks[1], (1, out_channels), jnp.float32)
    w3 = scale * jax.random.normal(ks[2], (3, 3, in_channels, out_channels), jnp.float32)
    b3 = scale * jax.random.normal(ks[3], (1, out_channels), jnp.float32)
    w5 = scale * jax.random.normal(ks[4], (5, 5, in_channels, out_channels), jnp.float32)
    b5 = scale * jax.random.normal(ks[5], (1, out_channels), jnp.float32)
    return (w1, b1, w3, b3, w5, b5)


if __name__ == "__main__":
    key = jax.random.PRNGKey(0)
    k_x, k_p = jax.random.split(key)

    N, Cin, H, W = 2, 4, 16, 16
    Cout = 8

    x = jax.random.normal(k_x, (N, Cin, H, W), jnp.float32)
    params = init_params(k_p, Cin, Cout)

    out = inception_forward(x, params)
    out = jax.block_until_ready(out)

    ref = jax.block_until_ready(_reference_forward(x, params))

    assert out.shape == (N, 3 * Cout, H, W), out.shape
    assert jnp.allclose(out, ref, atol=1e-4, rtol=1e-4), \
        f"max abs err = {jnp.max(jnp.abs(out - ref))}"

    print("KERNEL_OK")
</pallas_src>

<mosaic_0001>
module attributes {stable_mosaic.version = 11 : i64} {
  func.func @_inception_kernel(%arg0: i32, %arg1: i32, %arg2: memref<32x400xf32, #tpu.memory_space<vmem>>, %arg3: memref<400x384xf32, #tpu.memory_space<vmem>>, %arg4: memref<1x384xf32, #tpu.memory_space<vmem>>, %arg5: memref<32x384xf32, #tpu.memory_space<vmem>>) attributes {dimension_semantics = [#tpu.dimension_semantics<parallel>, #tpu.dimension_semantics<parallel>], iteration_bounds = array<i64: 1, 1>, scalar_prefetch = 0 : i64, scratch_operands = 0 : i64, tpu.core_type = #tpu.core_type<tc>, window_params = [{transform_indices = @transform_0, window_bounds = array<i64: 32, 400>}, {transform_indices = @transform_1, window_bounds = array<i64: 400, 384>}, {transform_indices = @transform_2, window_bounds = array<i64: 1, 384>}, {transform_indices = @transform_3, window_bounds = array<i64: 32, 384>}]} {
    %c0 = arith.constant 0 : index
    %c0_0 = arith.constant 0 : index
    %0 = vector.load %arg2[%c0, %c0_0] : memref<32x400xf32, #tpu.memory_space<vmem>>, vector<32x400xf32>
    %c0_1 = arith.constant 0 : index
    %c0_2 = arith.constant 0 : index
    %1 = vector.load %arg3[%c0_1, %c0_2] : memref<400x384xf32, #tpu.memory_space<vmem>>, vector<400x384xf32>
    %cst = arith.constant dense<0.000000e+00> : vector<32x384xf32>
    %2 = tpu.matmul %0, %1, %cst {dimension_numbers = #tpu.dot_dimension_numbers<[1], [0], [0], [1], [0, 0, 1, 1], [], []>} : vector<32x400xf32>, vector<400x384xf32>, vector<32x384xf32> -> vector<32x384xf32>
    %c0_3 = arith.constant 0 : index
    %c0_4 = arith.constant 0 : index
    %3 = vector.load %arg4[%c0_3, %c0_4] : memref<1x384xf32, #tpu.memory_space<vmem>>, vector<1x384xf32>
    %4 = vector.broadcast %3 : vector<1x384xf32> to vector<32x384xf32>
    %5 = arith.addf %2, %4 : vector<32x384xf32>
    %c0_5 = arith.constant 0 : index
    %c0_6 = arith.constant 0 : index
    %6 = vector.load %arg5[%c0_5, %c0_6] : memref<32x384xf32, #tpu.memory_space<vmem>>, vector<32x384xf32>
    tpu.vector_store %arg5[%c0_5, %c0_6], %5 {strides = array<i32>} : memref<32x384xf32, #tpu.memory_space<vmem>>, vector<32x384xf32>,
    return
  }
  func.func @transform_0(%arg0: i32, %arg1: i32) -> (i32, i32) {
    %c0_i32 = arith.constant 0 : i32
    %c0_i32_0 = arith.constant 0 : i32
    return %arg0, %c0_i32 : i32, i32
  }
  func.func @transform_1(%arg0: i32, %arg1: i32) -> (i32, i32) {
    %c0_i32 = arith.constant 0 : i32
    %c0_i32_0 = arith.constant 0 : i32
    return %c0_i32, %arg1 : i32, i32
  }
  func.func @transform_2(%arg0: i32, %arg1: i32) -> (i32, i32) {
    %c0_i32 = arith.constant 0 : i32
    %c0_i32_0 = arith.constant 0 : i32
    return %c0_i32, %arg1 : i32, i32
  }
  func.func @transform_3(%arg0: i32, %arg1: i32) -> (i32, i32) {
    %c0_i32 = arith.constant 0 : i32
    return %arg0, %arg1 : i32, i32
  }
}

</mosaic_0001>

<bundles_post_ra>
// kernel: _inception_jit.1
= control target key start
LH: loop header
LB: loop body
LE: loop exit
PB: predicated region body
PF: predicated region fallthrough
CT: control target
= control target key end

     0   :  { %vm188_vm0 = vcmask 130048   ;;  %s1247_s1 = inlined_call_operand.vmem [shape: f32[400,384], index: 1, kind: input, shape index: {}]   ;;  %s1248_s0 = inlined_call_operand.vmem [shape: f32[32,400], index: 0, kind: input, shape index: {}]   ;;  %s1249_s2 = inlined_call_operand.vmem [shape: f32[1,384], index: 2, kind: input, shape index: {}]   ;;  %s1250_s3 = inlined_call_operand.vmem [shape: f32[32,384], index: 3, kind: output, shape index: {}]  }
   0x1   :  { %v75_v0 = vld [vmem:[%s1247_s1 + $0x168] sm:$0xff]  ;;  %v177_v2 = vld [vmem:[%s1247_s1 + $0x498] sm:$0xff]  ;;  %v72_v3 = vld [vmem:[%s1247_s1 + $0x150] sm:$0xff] }
   0x2   :  { %v171_v1 = vld [vmem:[%s1247_s1 + $0x468] sm:$0xff]  ;;  %201 = vmatpush.msra.mxu0 %v75_v0  ;;  %v168_v5 = vld [vmem:[%s1247_s1 + $0x450] sm:$0xff]  ;;  %302 = vmatpush.msra.mxu3 %v177_v2  ;;  %v174_v6 = vld [vmem:[%s1247_s1 + $0x480] sm:$0xff] }
   0x3   :  { %259 = vmatpush.msra.mxu2 %v171_v1  ;;  %v123_v4 = vld [vmem:[%s1247_s1 + $0x2e8] sm:$0xff]  ;;  %v637_v7 = vld [vmem:[%s1248_s0 + $0x18] sm:$0xff]  ;;  %v76_v8 = vld [vmem:[%s1247_s1 + $0x170] sm:$0xff] }
   0x4   :  { %230 = vmatpush.msra.mxu1 %v123_v4  ;;  %202 = vmatpush.msra.mxu0 %v72_v3  ;;  %v69_v9 = vld [vmem:[%s1247_s1 + $0x138] sm:$0xff]  ;;  %v120_v10 = vld [vmem:[%s1247_s1 + $0x2d0] sm:$0xff]  ;;  %v66_v12 = vld [vmem:[%s1247_s1 + $0x120] sm:$0xff] }
   0x5   :  { %260 = vmatpush.msra.mxu2 %v168_v5  ;;  %v165_v11 = vld [vmem:[%s1247_s1 + $0x438] sm:$0xff]  ;;  %303 = vmatpush.msra.mxu3 %v174_v6  ;;  %v162_v15 = vld [vmem:[%s1247_s1 + $0x420] sm:$0xff]  ;;  %v63_v16 = vld [vmem:[%s1247_s1 + $0x108] sm:$0xff] }
   0x6   :  { %231 = vmatpush.msra.mxu1 %v120_v10  ;;  %v117_v13 = vld [vmem:[%s1247_s1 + $0x2b8] sm:$0xff]  ;;  %565 = vmatmul.msk.f32.vlgmr.msra.gmra.mxu3 %vm188_vm0, %v637_v7  ;;  %v114_v17 = vld [vmem:[%s1247_s1 + $0x2a0] sm:$0xff]  ;;  %v159_v19 = vld [vmem:[%s1247_s1 + $0x408] sm:$0xff] }
   0x7   :  { %203 = vmatpush.msra.mxu0 %v69_v9  ;;  %v73_v14 = vld [vmem:[%s1247_s1 + $0x158] sm:$0xff]  ;;  %317 = vmatpush.msrb.mxu3 %v76_v8  ;;  %v70_v18 = vld [vmem:[%s1247_s1 + $0x140] sm:$0xff]  ;;  %v60_v20 = vld [vmem:[%s1247_s1 + $0xf0] sm:$0xff] }
   0x8   :  { %261 = vmatpush.msra.mxu2 %v165_v11  ;;  %232 = vmatpush.msra.mxu1 %v117_v13  ;;  %v111_v21 = vld [vmem:[%s1247_s1 + $0x288] sm:$0xff]  ;;  %v156_v23 = vld [vmem:[%s1247_s1 + $0x3f0] sm:$0xff]  ;;  %v692_v24 = vld [vmem:[%s1248_s0 + $0x38] sm:$0xff] }
   0x9   :  { %204 = vmatpush.msra.mxu0 %v66_v12  ;;  %318 = vmatpush.msrb.mxu3 %v73_v14  ;;  %v67_v22 = vld [vmem:[%s1247_s1 + $0x128] sm:$0xff]  ;;  %v57_v25 = vld [vmem:[%s1247_s1 + $0xd8] sm:$0xff]  ;;  %v64_v26 = vld [vmem:[%s1247_s1 + $0x110] sm:$0xff] }
   0xa   :  { %262 = vmatpush.msra.mxu2 %v162_v15  ;;  %233 = vmatpush.msra.mxu1 %v114_v17  ;;  %v108_v27 = vld [vmem:[%s1247_s1 + $0x270] sm:$0xff]  ;;  %v153_v28 = vld [vmem:[%s1247_s1 + $0x3d8] sm:$0xff]  ;;  %v54_v29 = vld [vmem:[%s1247_s1 + $0xc0] sm:$0xff] }
   0xb   :  { %205 = vmatpush.msra.mxu0 %v63_v16  ;;  %319 = vmatpush.msrb.mxu3 %v70_v18  ;;  %v61_v30 = vld [vmem:[%s1247_s1 + $0xf8] sm:$0xff]  ;;  %v150_v32 = vld [vmem:[%s1247_s1 + $0x3c0] sm:$0xff]  ;;  %v51_v33 = vld [vmem:[%s1247_s1 + $0xa8] sm:$0xff] }
   0xc   :  { %263 = vmatpush.msra.mxu2 %v159_v19  ;;  %234 = vmatpush.msra.mxu1 %v111_v21  ;;  %v105_v31 = vld [vmem:[%s1247_s1 + $0x258] sm:$0xff]  ;;  %v58_v34 = vld [vmem:[%s1247_s1 + $0xe0] sm:$0xff]  ;;  %v147_v36 = vld [vmem:[%s1247_s1 + $0x3a8] sm:$0xff] }
   0xd   :  { %206 = vmatpush.msra.mxu0 %v60_v20  ;;  %320 = vmatpush.msrb.mxu3 %v67_v22  ;;  %v102_v35 = vld [vmem:[%s1247_s1 + $0x240] sm:$0xff]  ;;  %v48_v37 = vld [vmem:[%s1247_s1 + $0x90] sm:$0xff]  ;;  %v55_v38 = vld [vmem:[%s1247_s1 + $0xc8] sm:$0xff] }
   0xe   :  { %264 = vmatpush.msra.mxu2 %v156_v23  ;;  %566 = vmatmul.msk.f32.gmra.mxu3 %vm188_vm0, %v692_v24  ;;  %v99_v39 = vld [vmem:[%s1247_s1 + $0x228] sm:$0xff]  ;;  %v144_v40 = vld [vmem:[%s1247_s1 + $0x390] sm:$0xff]  ;;  %v747_v41 = vld [vmem:[%s1248_s0 + $0x58] sm:$0xff] }
   0xf   :  { %207 = vmatpush.msra.mxu0 %v57_v25  ;;  %321 = vmatpush.msrb.mxu3 %v64_v26  ;;  %v52_v42 = vld [vmem:[%s1247_s1 + $0xb0] sm:$0xff]  ;;  %v45_v43 = vld [vmem:[%s1247_s1 + $0x78] sm:$0xff]  ;;  %v42_v47 = vld [vmem:[%s1247_s1 + $0x60] sm:$0xff] }
  0x10   :  { %235 = vmatpush.msra.mxu1 %v108_v27  ;;  %265 = vmatpush.msra.mxu2 %v153_v28  ;;  %v96_v44 = vld [vmem:[%s1247_s1 + $0x210] sm:$0xff]  ;;  %v141_v45 = vld [vmem:[%s1247_s1 + $0x378] sm:$0xff]  ;;  %v138_v49 = vld [vmem:[%s1247_s1 + $0x360] sm:$0xff] }
  0x11   :  { %208 = vmatpush.msra.mxu0 %v54_v29  ;;  %322 = vmatpush.msrb.mxu3 %v61_v30  ;;  %v49_v46 = vld [vmem:[%s1247_s1 + $0x98] sm:$0xff]  ;;  %v46_v50 = vld [vmem:[%s1247_s1 + $0x80] sm:$0xff]  ;;  %v39_v51 = vld [vmem:[%s1247_s1 + $0x48] sm:$0xff] }
  0x12   :  { %236 = vmatpush.msra.mxu1 %v105_v31  ;;  %266 = vmatpush.msra.mxu2 %v150_v32  ;;  %v93_v48 = vld [vmem:[%s1247_s1 + $0x1f8] sm:$0xff]  ;;  %v90_v52 = vld [vmem:[%s1247_s1 + $0x1e0] sm:$0xff]  ;;  %v135_v53 = vld [vmem:[%s1247_s1 + $0x348] sm:$0xff] }
  0x13   :  { %209 = vmatpush.msra.mxu0 %v51_v33  ;;  %323 = vmatpush.msrb.mxu3 %v58_v34  ;;  %v43_v54 = vld [vmem:[%s1247_s1 + $0x68] sm:$0xff]  ;;  %v36_v55 = vld [vmem:[%s1247_s1 + $0x30] sm:$0xff]  ;;  %v802_v58 = vld [vmem:[%s1248_s0 + $0x78] sm:$0xff] }
  0x14   :  { %237 = vmatpush.msra.mxu1 %v102_v35  ;;  %267 = vmatpush.msra.mxu2 %v147_v36  ;;  %v87_v56 = vld [vmem:[%s1247_s1 + $0x1c8] sm:$0xff]  ;;  %v132_v57 = vld [vmem:[%s1247_s1 + $0x330] sm:$0xff]  ;;  %v33_v59 = vld [vmem:[%s1247_s1 + $0x18] sm:$0xff] }
  0x15   :  { %210 = vmatpush.msra.mxu0 %v48_v37  ;;  %324 = vmatpush.msrb.mxu3 %v55_v38  ;;  %v40_v60 = vld [vmem:[%s1247_s1 + $0x50] sm:$0xff]  ;;  %v129_v62 = vld [vmem:[%s1247_s1 + $0x318] sm:$0xff]  ;;  %v30_v63 = vld [vmem:[%s1247_s1] sm:$0xff] }
  0x16   :  { %238 = vmatpush.msra.mxu1 %v99_v39  ;;  %268 = vmatpush.msra.mxu2 %v144_v40  ;;  %v84_v61 = vld [vmem:[%s1247_s1 + $0x1b0] sm:$0xff]  ;;  %v37_v0 = vld [vmem:[%s1247_s1 + $0x38] sm:$0xff]  ;;  %v126_v2 = vld [vmem:[%s1247_s1 + $0x300] sm:$0xff] }
  0x17   :  { %567 = vmatmul.msk.f32.gmra.mxu3 %vm188_vm0, %v747_v41  ;;  %211 = vmatpush.msra.mxu0 %v45_v43  ;;  %v81_v1 = vld [vmem:[%s1247_s1 + $0x198] sm:$0xff]  ;;  %v833_v3 = vld [vmem:[%s1248_s0] sm:$0xff]  ;;  %v838_v4 = vld [vmem:[%s1248_s0 + $0x10] sm:$0xff] }
  0x18   :  { %325 = vmatpush.msrb.mxu3 %v52_v42  ;;  %239 = vmatpush.msra.mxu1 %v96_v44  ;;  %v34_v5 = vld [vmem:[%s1247_s1 + $0x20] sm:$0xff]  ;;  %v124_v9 = vld [vmem:[%s1247_s1 + $0x2f0] sm:$0xff]  ;;  %v856_v10 = vld [vmem:[%s1248_s0 + $0x8] sm:$0xff] }
  0x19   :  { %269 = vmatpush.msra.mxu2 %v141_v45  ;;  %212 = vmatpush.msra.mxu0 %v42_v47  ;;  %v178_v6 = vld [vmem:[%s1247_s1 + $0x4a0] sm:$0xff]  ;;  %v31_v11 = vld [vmem:[%s1247_s1 + $0x8] sm:$0xff]  ;;  %v172_v12 = vld [vmem:[%s1247_s1 + $0x470] sm:$0xff] }
  0x1a   :  { %326 = vmatpush.msrb.mxu3 %v49_v46  ;;  %240 = vmatpush.msra.mxu1 %v93_v48  ;;  %v78_v8 = vld [vmem:[%s1247_s1 + $0x180] sm:$0xff]  ;;  %v121_v13 = vld [vmem:[%s1247_s1 + $0x2d8] sm:$0xff]  ;;  %v175_v17 = vld [vmem:[%s1247_s1 + $0x488] sm:$0xff] }
  0x1b   :  { %270 = vmatpush.msra.mxu2 %v138_v49  ;;  %213 = vmatpush.msra.mxu0 %v39_v51  ;;  %v77_v14 = vld [vmem:[%s1247_s1 + $0x178] sm:$0xff]  ;;  %v118_v16 = vld [vmem:[%s1247_s1 + $0x2c0] sm:$0xff]  ;;  %v115_v20 = vld [vmem:[%s1247_s1 + $0x2a8] sm:$0xff] }
  0x1c   :  { %327 = vmatpush.msrb.mxu3 %v46_v50  ;;  %241 = vmatpush.msra.mxu1 %v90_v52  ;;  %v169_v15 = vld [vmem:[%s1247_s1 + $0x458] sm:$0xff]  ;;  %v74_v18 = vld [vmem:[%s1247_s1 + $0x160] sm:$0xff]  ;;  %v894_v21 = vld [vmem:[%s1248_s0 + $0x30] sm:$0xff] }
  0x1d   :  { %271 = vmatpush.msra.mxu2 %v135_v53  ;;  %214 = vmatpush.msra.mxu0 %v36_v55  ;;  %v166_v19 = vld [vmem:[%s1247_s1 + $0x440] sm:$0xff]  ;;  %v71_v23 = vld [vmem:[%s1247_s1 + $0x148] sm:$0xff]  ;;  %v112_v25 = vld [vmem:[%s1247_s1 + $0x290] sm:$0xff] }
  0x1e   :  { %328 = vmatpush.msrb.mxu3 %v43_v54  ;;  %242 = vmatpush.msra.mxu1 %v87_v56  ;;  %v899_v22 = vld [vmem:[%s1248_s0 + $0x20] sm:$0xff]  ;;  %v163_v26 = vld [vmem:[%s1247_s1 + $0x428] sm:$0xff]  ;;  %v68_v28 = vld [vmem:[%s1247_s1 + $0x130] sm:$0xff] }
  0x1f   :  { %272 = vmatpush.msra.mxu2 %v132_v57  ;;  %568 = vmatmul.msk.f32.gmra.mxu3 %vm188_vm0, %v802_v58  ;;  %v914_v27 = vld [vmem:[%s1248_s0 + $0x28] sm:$0xff]  ;;  %v109_v29 = vld [vmem:[%s1247_s1 + $0x278] sm:$0xff]  ;;  %v160_v30 = vld [vmem:[%s1247_s1 + $0x410] sm:$0xff] }
  0x20   :  { %215 = vmatpush.msra.mxu0 %v33_v59  ;;  %329 = vmatpush.msrb.mxu3 %v40_v60  ;;  %v179_v31 = vld [vmem:[%s1247_s1 + $0x4a8] sm:$0xff]  ;;  %v65_v32 = vld [vmem:[%s1247_s1 + $0x118] sm:$0xff]  ;;  %v106_v33 = vld [vmem:[%s1247_s1 + $0x260] sm:$0xff] }
  0x21   :  { %243 = vmatpush.msra.mxu1 %v84_v61  ;;  %273 = vmatpush.msra.mxu2 %v129_v62  ;;  %v157_v34 = vld [vmem:[%s1247_s1 + $0x3f8] sm:$0xff]  ;;  %v62_v35 = vld [vmem:[%s1247_s1 + $0x100] sm:$0xff]  ;;  %v103_v36 = vld [vmem:[%s1247_s1 + $0x248] sm:$0xff] }
  0x22   :  { %216 = vmatpush.msra.mxu0 %v30_v63  ;;  %330 = vmatpush.msrb.mxu3 %v37_v0  ;;  %v154_v37 = vld [vmem:[%s1247_s1 + $0x3e0] sm:$0xff]  ;;  %v957_v39 = vld [vmem:[%s1248_s0 + $0x50] sm:$0xff]  ;;  %v59_v40 = vld [vmem:[%s1247_s1 + $0xe8] sm:$0xff] }
  0x23   :  { %244 = vmatpush.msra.mxu1 %v81_v1  ;;  %274 = vmatpush.msra.mxu2 %v126_v2  ;;  %v952_v38 = vld [vmem:[%s1248_s0 + $0x40] sm:$0xff]  ;;  %v100_v42 = vld [vmem:[%s1247_s1 + $0x230] sm:$0xff]  ;;  %v151_v43 = vld [vmem:[%s1247_s1 + $0x3c8] sm:$0xff] }
  0x24   :  { %217 = vmatmul.f32.vlgmr.msra.gmra.mxu0 %v833_v3  ;;  %275 = vmatmul.f32.vlgmr.msra.gmra.mxu2 %v838_v4  ;;  %v972_v44 = vld [vmem:[%s1248_s0 + $0x48] sm:$0xff]  ;;  %v56_v45 = vld [vmem:[%s1247_s1 + $0xd0] sm:$0xff]  ;;  %v97_v46 = vld [vmem:[%s1247_s1 + $0x218] sm:$0xff] }
  0x25   :  { %331 = vmatpush.msrb.mxu3 %v34_v5  ;;  %418 = vmatpush.msrb.mxu2 %v178_v6  ;;  %v148_v47 = vld [vmem:[%s1247_s1 + $0x3b0] sm:$0xff]  ;;  %v53_v48 = vld [vmem:[%s1247_s1 + $0xb8] sm:$0xff]  ;;  %v94_v49 = vld [vmem:[%s1247_s1 + $0x200] sm:$0xff] }
  0x26   :  { %245 = vmatpush.msra.mxu1 %v78_v8  ;;  %346 = vmatpush.msrb.mxu0 %v124_v9  ;;  %v145_v50 = vld [vmem:[%s1247_s1 + $0x398] sm:$0xff]  ;;  %v50_v51 = vld [vmem:[%s1247_s1 + $0xa0] sm:$0xff]  ;;  %v91_v52 = vld [vmem:[%s1247_s1 + $0x1e8] sm:$0xff] }
  0x27   :  { %246 = vmatmul.f32.vlgmr.msra.gmra.mxu1 %v856_v10  ;;  %332 = vmatpush.msrb.mxu3 %v31_v11  ;;  %v176_v53 = vld [vmem:[%s1247_s1 + $0x490] sm:$0xff]  ;;  %v142_v54 = vld [vmem:[%s1247_s1 + $0x380] sm:$0xff]  ;;  %v47_v57 = vld [vmem:[%s1247_s1 + $0x88] sm:$0xff] }
  0x28   :  { %375 = vmatpush.msrb.mxu1 %v172_v12  ;;  %347 = vmatpush.msrb.mxu0 %v121_v13  ;;  %v1010_v55 = vld [vmem:[%s1248_s0 + $0x60] sm:$0xff]  ;;  %v1015_v56 = vld [vmem:[%s1248_s0 + $0x70] sm:$0xff]  ;;  %v139_v60 = vld [vmem:[%s1247_s1 + $0x368] sm:$0xff] }
  0x29   :  { %333 = vmatmul.f32.vlgmr.msrb.gmra.mxu3 %v833_v3  ;;  %419 = vmatpush.msrb.mxu2 %v175_v17  ;;  %v88_v59 = vld [vmem:[%s1247_s1 + $0x1d0] sm:$0xff]  ;;  %v1030_v61 = vld [vmem:[%s1248_s0 + $0x68] sm:$0xff]  ;;  %v85_v63 = vld [vmem:[%s1247_s1 + $0x1b8] sm:$0xff] }
  0x2a   :  { %433 = vmatpush.msra.mxu3 %v77_v14  ;;  %376 = vmatpush.msrb.mxu1 %v169_v15  ;;  %v44_v62 = vld [vmem:[%s1247_s1 + $0x70] sm:$0xff]  ;;  %v41_v1 = vld [vmem:[%s1247_s1 + $0x58] sm:$0xff]  ;;  %v82_v2 = vld [vmem:[%s1247_s1 + $0x1a0] sm:$0xff] }
  0x2b   :  { %348 = vmatpush.msrb.mxu0 %v118_v16  ;;  %534 = vmatpush.msra.mxu2 %v179_v31  ;;  %v136_v0 = vld [vmem:[%s1247_s1 + $0x350] sm:$0xff]  ;;  %v133_v5 = vld [vmem:[%s1247_s1 + $0x338] sm:$0xff]  ;;  %v38_v6 = vld [vmem:[%s1247_s1 + $0x40] sm:$0xff] }
  0x2c   :  { %434 = vmatpush.msra.mxu3 %v74_v18  ;;  %377 = vmatpush.msrb.mxu1 %v166_v19  ;;  %v79_v8 = vld [vmem:[%s1247_s1 + $0x188] sm:$0xff]  ;;  %v130_v9 = vld [vmem:[%s1247_s1 + $0x320] sm:$0xff]  ;;  %v125_v13 = vld [vmem:[%s1247_s1 + $0x2f8] sm:$0xff] }
  0x2d   :  { %349 = vmatpush.msrb.mxu0 %v115_v20  ;;  %278 = vmatmul.f32.gmra.mxu2 %v894_v21  ;;  %v35_v11 = vld [vmem:[%s1247_s1 + $0x28] sm:$0xff]  ;;  %v32_v14 = vld [vmem:[%s1247_s1 + $0x10] sm:$0xff]  ;;  %v122_v15 = vld [vmem:[%s1247_s1 + $0x2e0] sm:$0xff] }
  0x2e   :  { %220 = vmatmul.f32.gmra.mxu0 %v899_v22  ;;  %435 = vmatpush.msra.mxu3 %v71_v23  ;;  %v127_v12 = vld [vmem:[%s1247_s1 + $0x308] sm:$0xff]  ;;  %v173_v16 = vld [vmem:[%s1247_s1 + $0x478] sm:$0xff]  ;;  %v170_v18 = vld [vmem:[%s1247_s1 + $0x460] sm:$0xff] }
  0x2f   :  { %350 = vmatpush.msrb.mxu0 %v112_v25  ;;  %378 = vmatpush.msrb.mxu1 %v163_v26  ;;  %v119_v17 = vld [vmem:[%s1247_s1 + $0x2c8] sm:$0xff]  ;;  %v116_v19 = vld [vmem:[%s1247_s1 + $0x2b0] sm:$0xff]  ;;  %v113_v23 = vld [vmem:[%s1247_s1 + $0x298] sm:$0xff] }
  0x30   :  { %249 = vmatmul.f32.gmra.mxu1 %v914_v27  ;;  %436 = vmatpush.msra.mxu3 %v68_v28  ;;  %v167_v20 = vld [vmem:[%s1247_s1 + $0x448] sm:$0xff]  ;;  %v110_v25 = vld [vmem:[%s1247_s1 + $0x280] sm:$0xff]  ;;  %v161_v26 = vld [vmem:[%s1247_s1 + $0x418] sm:$0xff] }
  0x31   :  { %351 = vmatpush.msrb.mxu0 %v109_v29  ;;  %379 = vmatpush.msrb.mxu1 %v160_v30  ;;  %v107_v28 = vld [vmem:[%s1247_s1 + $0x268] sm:$0xff]  ;;  %v158_v29 = vld [vmem:[%s1247_s1 + $0x400] sm:$0xff]  ;;  %v104_v30 = vld [vmem:[%s1247_s1 + $0x250] sm:$0xff] }
  0x32   :  { %336 = vmatmul.f32.gmra.mxu3 %v899_v22  ;;  %535 = vmatpush.msra.mxu2 %v176_v53  ;;  %v155_v31 = vld [vmem:[%s1247_s1 + $0x3e8] sm:$0xff] }
  0x33   :  { %437 = vmatpush.msra.mxu3 %v65_v32  ;;  %352 = vmatpush.msrb.mxu0 %v106_v33  ;;  %v101_v32 = vld [vmem:[%s1247_s1 + $0x238] sm:$0xff]  ;;  %v98_v33 = vld [vmem:[%s1247_s1 + $0x220] sm:$0xff] }
  0x34   :  { %380 = vmatpush.msrb.mxu1 %v157_v34  ;;  %v149_v34 = vld [vmem:[%s1247_s1 + $0x3b8] sm:$0xff] }
  0x35   :  { %438 = vmatpush.msra.mxu3 %v62_v35  ;;  %353 = vmatpush.msrb.mxu0 %v103_v36  ;;  %v95_v35 = vld [vmem:[%s1247_s1 + $0x208] sm:$0xff]  ;;  %v146_v36 = vld [vmem:[%s1247_s1 + $0x3a0] sm:$0xff] }
  0x36   :  { %381 = vmatpush.msrb.mxu1 %v154_v37  ;;  %223 = vmatmul.f32.gmra.mxu0 %v952_v38  ;;  %v92_v37 = vld [vmem:[%s1247_s1 + $0x1f0] sm:$0xff] }
  0x37   :  { %281 = vmatmul.f32.gmra.mxu2 %v957_v39  ;;  %439 = vmatpush.msra.mxu3 %v59_v40  ;;  %v143_v40 = vld [vmem:[%s1247_s1 + $0x388] sm:$0xff] }
  0x38   :  { %354 = vmatpush.msrb.mxu0 %v100_v42  ;;  %382 = vmatpush.msrb.mxu1 %v151_v43  ;;  %v89_v42 = vld [vmem:[%s1247_s1 + $0x1d8] sm:$0xff]  ;;  %v86_v43 = vld [vmem:[%s1247_s1 + $0x1c0] sm:$0xff] }
  0x39   :  { %252 = vmatmul.f32.gmra.mxu1 %v972_v44  ;;  %440 = vmatpush.msra.mxu3 %v56_v45  ;;  %v137_v45 = vld [vmem:[%s1247_s1 + $0x358] sm:$0xff] }
  0x3a   :  { %355 = vmatpush.msrb.mxu0 %v97_v46  ;;  %383 = vmatpush.msrb.mxu1 %v148_v47  ;;  %v83_v46 = vld [vmem:[%s1247_s1 + $0x1a8] sm:$0xff]  ;;  %v134_v47 = vld [vmem:[%s1247_s1 + $0x340] sm:$0xff] }
  0x3b   :  { %339 = vmatmul.f32.gmra.mxu3 %v952_v38 }
  0x3c   :  { %441 = vmatpush.msra.mxu3 %v53_v48  ;;  %356 = vmatpush.msrb.mxu0 %v94_v49  ;;  %v80_v48 = vld [vmem:[%s1247_s1 + $0x190] sm:$0xff]  ;;  %v131_v49 = vld [vmem:[%s1247_s1 + $0x328] sm:$0xff] }
  0x3d   :  { %384 = vmatpush.msrb.mxu1 %v145_v50  ;;  %v128_v50 = vld [vmem:[%s1247_s1 + $0x310] sm:$0xff] }
  0x3e   :  { %442 = vmatpush.msra.mxu3 %v50_v51  ;;  %357 = vmatpush.msrb.mxu0 %v91_v52 }
  0x3f   :  { %385 = vmatpush.msrb.mxu1 %v142_v54  ;;  %226 = vmatmul.f32.gmra.mxu0 %v1010_v55 }
  0x40   :  { %284 = vmatmul.f32.gmra.mxu2 %v1015_v56  ;;  %443 = vmatpush.msra.mxu3 %v47_v57 }
  0x41   :  { %358 = vmatpush.msrb.mxu0 %v88_v59  ;;  %386 = vmatpush.msrb.mxu1 %v139_v60 }
  0x42   :  { %255 = vmatmul.f32.gmra.mxu1 %v1030_v61  ;;  %444 = vmatpush.msra.mxu3 %v44_v62 }
  0x43   :  { %359 = vmatpush.msrb.mxu0 %v85_v63  ;;  %387 = vmatpush.msrb.mxu1 %v136_v0 }
  0x44   :  { %342 = vmatmul.f32.gmra.mxu3 %v1010_v55 }
  0x45   :  { %445 = vmatpush.msra.mxu3 %v41_v1  ;;  %360 = vmatpush.msrb.mxu0 %v82_v2 }
  0x46   :  { %388 = vmatpush.msrb.mxu1 %v133_v5 }
  0x47   :  { %446 = vmatpush.msra.mxu3 %v38_v6  ;;  %361 = vmatpush.msrb.mxu0 %v79_v8 }
  0x48   :  { %389 = vmatpush.msrb.mxu1 %v130_v9  ;;  %362 = vmatmul.f32.vlgmr.msrb.gmra.mxu0 %v856_v10 }
  0x49   :  { %569 = vmatmul.msk.f32.vlgmr.msrb.gmra.mxu2 %vm188_vm0, %v637_v7  ;;  %447 = vmatpush.msra.mxu3 %v35_v11 }
  0x4a   :  { %390 = vmatpush.msrb.mxu1 %v127_v12  ;;  %462 = vmatpush.msra.mxu0 %v125_v13 }
  0x4b   :  { %391 = vmatmul.f32.vlgmr.msrb.gmra.mxu1 %v838_v4  ;;  %448 = vmatpush.msra.mxu3 %v32_v14 }
  0x4c   :  { %463 = vmatpush.msra.mxu0 %v122_v15  ;;  %491 = vmatpush.msra.mxu1 %v173_v16 }
  0x4d   :  { %449 = vmatmul.f32.vlgmr.msra.gmra.mxu3 %v833_v3  ;;  %v164_v3 = vld [vmem:[%s1247_s1 + $0x430] sm:$0xff] }
  0x4e   :  { %577 = vmatpush.msrb.mxu3 %v125_v13  ;;  %464 = vmatpush.msra.mxu0 %v119_v17 }
  0x4f   :  { %492 = vmatpush.msra.mxu1 %v170_v18 }
  0x50   :  { %578 = vmatpush.msrb.mxu3 %v122_v15  ;;  %465 = vmatpush.msra.mxu0 %v116_v19 }
  0x51   :  { %493 = vmatpush.msra.mxu1 %v167_v20  ;;  %365 = vmatmul.f32.gmra.mxu0 %v914_v27 }
  0x52   :  { %570 = vmatmul.msk.f32.gmra.mxu2 %vm188_vm0, %v692_v24  ;;  %579 = vmatpush.msrb.mxu3 %v119_v17 }
  0x53   :  { %466 = vmatpush.msra.mxu0 %v113_v23  ;;  %494 = vmatpush.msra.mxu1 %v164_v3 }
  0x54   :  { %394 = vmatmul.f32.gmra.mxu1 %v894_v21  ;;  %580 = vmatpush.msrb.mxu3 %v116_v19 }
  0x55   :  { %467 = vmatpush.msra.mxu0 %v110_v25  ;;  %495 = vmatpush.msra.mxu1 %v161_v26 }
  0x56   :  { %452 = vmatmul.f32.gmra.mxu3 %v899_v22  ;;  %v152_v22 = vld [vmem:[%s1247_s1 + $0x3d0] sm:$0xff] }
  0x57   :  { %581 = vmatpush.msrb.mxu3 %v113_v23  ;;  %468 = vmatpush.msra.mxu0 %v107_v28 }
  0x58   :  { %496 = vmatpush.msra.mxu1 %v158_v29 }
  0x59   :  { %582 = vmatpush.msrb.mxu3 %v110_v25  ;;  %469 = vmatpush.msra.mxu0 %v104_v30 }
  0x5a   :  { %497 = vmatpush.msra.mxu1 %v155_v31  ;;  %368 = vmatmul.f32.gmra.mxu0 %v972_v44 }
  0x5b   :  { %571 = vmatmul.msk.f32.gmra.mxu2 %vm188_vm0, %v747_v41  ;;  %583 = vmatpush.msrb.mxu3 %v107_v28 }
  0x5c   :  { %470 = vmatpush.msra.mxu0 %v101_v32  ;;  %498 = vmatpush.msra.mxu1 %v152_v22 }
  0x5d   :  { %397 = vmatmul.f32.gmra.mxu1 %v957_v39  ;;  %584 = vmatpush.msrb.mxu3 %v104_v30 }
  0x5e   :  { %471 = vmatpush.msra.mxu0 %v98_v33  ;;  %499 = vmatpush.msra.mxu1 %v149_v34 }
  0x5f   :  { %455 = vmatmul.f32.gmra.mxu3 %v952_v38  ;;  %v140_v38 = vld [vmem:[%s1247_s1 + $0x370] sm:$0xff] }
  0x60   :  { %585 = vmatpush.msrb.mxu3 %v101_v32  ;;  %472 = vmatpush.msra.mxu0 %v95_v35 }
  0x61   :  { %500 = vmatpush.msra.mxu1 %v146_v36 }
  0x62   :  { %586 = vmatpush.msrb.mxu3 %v98_v33  ;;  %473 = vmatpush.msra.mxu0 %v92_v37 }
  0x63   :  { %501 = vmatpush.msra.mxu1 %v143_v40  ;;  %371 = vmatmul.f32.gmra.mxu0 %v1030_v61 }
  0x64   :  { %572 = vmatmul.msk.f32.gmra.mxu2 %vm188_vm0, %v802_v58  ;;  %587 = vmatpush.msrb.mxu3 %v95_v35 }
  0x65   :  { %474 = vmatpush.msra.mxu0 %v89_v42  ;;  %502 = vmatpush.msra.mxu1 %v140_v38 }
  0x66   :  { %400 = vmatmul.f32.gmra.mxu1 %v1015_v56  ;;  %588 = vmatpush.msrb.mxu3 %v92_v37 }
  0x67   :  { %475 = vmatpush.msra.mxu0 %v86_v43  ;;  %503 = vmatpush.msra.mxu1 %v137_v45 }
  0x68   :  { %458 = vmatmul.f32.gmra.mxu3 %v1010_v55 }
  0x69   :  { %589 = vmatpush.msrb.mxu3 %v89_v42  ;;  %476 = vmatpush.msra.mxu0 %v83_v46 }
  0x6a   :  { %504 = vmatpush.msra.mxu1 %v134_v47 }
  0x6b   :  { %590 = vmatpush.msrb.mxu3 %v86_v43  ;;  %477 = vmatpush.msra.mxu0 %v80_v48 }
  0x6c   :  { %505 = vmatpush.msra.mxu1 %v131_v49  ;;  %478 = vmatmul.f32.vlgmr.msra.gmra.mxu0 %v856_v10 }
  0x6d   :  { %591 = vmatpush.msrb.mxu3 %v83_v46  ;;  %573 = vmatmul.msk.f32.vlgmr.msra.gmra.mxu2 %vm188_vm0, %v637_v7 }
  0x6e   :  { %506 = vmatpush.msra.mxu1 %v128_v50 }
  0x6f   :  { %592 = vmatpush.msrb.mxu3 %v80_v48  ;;  %507 = vmatmul.f32.vlgmr.msra.gmra.mxu1 %v838_v4 }
  0x70   :  { %481 = vmatmul.f32.vlgmr.msrb.gmra.mxu3 %v914_v27 }
  0x75   :  { %574 = vmatmul.msk.f32.gmra.mxu2 %vm188_vm0, %v692_v24  ;;  %v1206_v24 = vld [vmem:[%s1249_s2] sm:$0x7] }
  0x76   :  { %v183_v16 = vperm.slane %v1206_v24, 1 }
  0x77   :  { %510 = vmatmul.f32.gmra.mxu1 %v894_v21  ;;  %v182_v21 = vperm.slane %v1206_v24, 0 }
  0x78   :  { %484 = vmatmul.f32.gmra.mxu3 %v972_v44 }
  0x7d   :  { %575 = vmatmul.msk.f32.gmra.mxu2 %vm188_vm0, %v747_v41 }
  0x7f   :  { %513 = vmatmul.f32.gmra.mxu1 %v957_v39 }
  0x80   :  { %487 = vmatmul.f32.gmra.mxu3 %v1030_v61 }
  0x85   :  { %576 = vmatmul.msk.f32.gmra.mxu2 %vm188_vm0, %v802_v58 }
  0x87   :  { %516 = vmatmul.f32.gmra.mxu1 %v1015_v56 }
  0x89   :  { %v305_v7 = vpop.f32.mrf.mxu3 }
  0x91   :  { %v308_v4 = vpop.f32.mrf.mxu3 }
  0x9a   :  { %v311_v10 = vpop.f32.mrf.mxu3 }
  0xa1   :  { %v218_v41 = vpop.f32.mrf.mxu0 }
  0xa2   :  { %v219_v27 = vadd.f32 %v218_v41, %v182_v21  ;;  %v314_v39 = vpop.f32.mrf.mxu3 }
  0xa4   :  { %v247_v44 = vpop.f32.mrf.mxu1 }
  0xa5   :  { %v248_v51 = vadd.f32 %v247_v44, %v219_v27 }
  0xa7   :  { %v276_v52 = vpop.f32.mrf.mxu2 }
  0xa8   :  { %v277_v53 = vadd.f32 %v276_v52, %v248_v51 }
  0xaa   :  { %v306_v58 = vadd.f32 %v305_v7, %v277_v53 }
  0xab   :  { %v221_v54 = vpop.f32.mrf.mxu0 }
  0xac   :  { %v222_v55 = vadd.f32 %v221_v54, %v182_v21  ;;  %v334_v56 = vpop.f32.mrf.mxu3  ;;  %549 = vst [vmem:[%s1250_s3] sm:$0xff] %v306_v58 }
  0xad   :  { %v250_v57 = vpop.f32.mrf.mxu1  ;;  %v335_v19 = vadd.f32 %v334_v56, %v183_v16 }
  0xae   :  { %v251_v59 = vadd.f32 %v250_v57, %v222_v55 }
  0xb0   :  { %v279_v60 = vpop.f32.mrf.mxu2 }
  0xb1   :  { %v280_v61 = vadd.f32 %v279_v60, %v251_v59 }
  0xb3   :  { %v309_v62 = vadd.f32 %v308_v4, %v280_v61  ;;  %v224_v63 = vpop.f32.mrf.mxu0 }
  0xb4   :  { %v225_v0 = vadd.f32 %v224_v63, %v182_v21 }
  0xb5   :  { %552 = vst [vmem:[%s1250_s3 + $0x18] sm:$0xff] %v309_v62  ;;  %v337_v1 = vpop.f32.mrf.mxu3 }
  0xb6   :  { %v253_v2 = vpop.f32.mrf.mxu1  ;;  %v338_v31 = vadd.f32 %v337_v1, %v183_v16 }
  0xb7   :  { %v254_v5 = vadd.f32 %v253_v2, %v225_v0 }
  0xba   :  { %v282_v6 = vpop.f32.mrf.mxu2 }
  0xbb   :  { %v283_v8 = vadd.f32 %v282_v6, %v254_v5 }
  0xbc   :  { %v227_v9 = vpop.f32.mrf.mxu0 }
  0xbd   :  { %v312_v11 = vadd.f32 %v311_v10, %v283_v8  ;;  %v228_v12 = vadd.f32 %v227_v9, %v182_v21  ;;  %v184_v21 = vperm.slane %v1206_v24, 2 }
  0xbe   :  { %v340_v13 = vpop.f32.mrf.mxu3 }
  0xbf   :  { %555 = vst [vmem:[%s1250_s3 + $0x30] sm:$0xff] %v312_v11  ;;  %v256_v14 = vpop.f32.mrf.mxu1  ;;  %v341_v40 = vadd.f32 %v340_v13, %v183_v16 }
  0xc0   :  { %v257_v15 = vadd.f32 %v256_v14, %v228_v12 }
  0xc3   :  { %v285_v17 = vpop.f32.mrf.mxu2 }
  0xc4   :  { %v286_v18 = vadd.f32 %v285_v17, %v257_v15 }
  0xc5   :  { %v363_v20 = vpop.f32.mrf.mxu0 }
  0xc6   :  { %v315_v23 = vadd.f32 %v314_v39, %v286_v18  ;;  %v364_v3 = vadd.f32 %v363_v20, %v335_v19 }
  0xc7   :  { %v343_v25 = vpop.f32.mrf.mxu3 }
  0xc8   :  { %558 = vst [vmem:[%s1250_s3 + $0x48] sm:$0xff] %v315_v23  ;;  %v392_v26 = vpop.f32.mrf.mxu1  ;;  %v344_v49 = vadd.f32 %v343_v25, %v183_v16 }
  0xc9   :  { %v393_v28 = vadd.f32 %v392_v26, %v364_v3 }
  0xcc   :  { %v421_v29 = vpop.f32.mrf.mxu2 }
  0xcd   :  { %v422_v30 = vadd.f32 %v421_v29, %v393_v28 }
  0xce   :  { %v366_v32 = vpop.f32.mrf.mxu0 }
  0xcf   :  { %550 = vst [vmem:[%s1250_s3 + $0x8] sm:$0xff] %v422_v30  ;;  %v367_v22 = vadd.f32 %v366_v32, %v338_v31 }
  0xd0   :  { %v450_v33 = vpop.f32.mrf.mxu3 }
  0xd1   :  { %v395_v34 = vpop.f32.mrf.mxu1  ;;  %v451_v44 = vadd.f32 %v450_v33, %v184_v21 }
  0xd2   :  { %v396_v35 = vadd.f32 %v395_v34, %v367_v22 }
  0xd5   :  { %v424_v36 = vpop.f32.mrf.mxu2 }
  0xd6   :  { %v425_v37 = vadd.f32 %v424_v36, %v396_v35 }
  0xd7   :  { %v369_v42 = vpop.f32.mrf.mxu0 }
  0xd8   :  { %553 = vst [vmem:[%s1250_s3 + $0x20] sm:$0xff] %v425_v37  ;;  %v370_v38 = vadd.f32 %v369_v42, %v341_v40 }
  0xd9   :  { %v453_v43 = vpop.f32.mrf.mxu3 }
  0xda   :  { %v398_v45 = vpop.f32.mrf.mxu1  ;;  %v454_v57 = vadd.f32 %v453_v43, %v184_v21 }
  0xdb   :  { %v399_v46 = vadd.f32 %v398_v45, %v370_v38 }
  0xde   :  { %v427_v47 = vpop.f32.mrf.mxu2 }
  0xdf   :  { %v428_v48 = vadd.f32 %v427_v47, %v399_v46 }
  0xe0   :  { %v372_v50 = vpop.f32.mrf.mxu0 }
  0xe1   :  { %556 = vst [vmem:[%s1250_s3 + $0x38] sm:$0xff] %v428_v48  ;;  %v373_v7 = vadd.f32 %v372_v50, %v344_v49 }
  0xe2   :  { %v456_v4 = vpop.f32.mrf.mxu3 }
  0xe3   :  { %v401_v10 = vpop.f32.mrf.mxu1  ;;  %v457_v0 = vadd.f32 %v456_v4, %v184_v21 }
  0xe4   :  { %v402_v41 = vadd.f32 %v401_v10, %v373_v7 }
  0xe7   :  { %v430_v27 = vpop.f32.mrf.mxu2 }
  0xe8   :  { %v431_v39 = vadd.f32 %v430_v27, %v402_v41 }
  0xe9   :  { %v479_v51 = vpop.f32.mrf.mxu0 }
  0xea   :  { %559 = vst [vmem:[%s1250_s3 + $0x50] sm:$0xff] %v431_v39  ;;  %v480_v52 = vadd.f32 %v479_v51, %v451_v44 }
  0xeb   :  { %v459_v53 = vpop.f32.mrf.mxu3 }
  0xec   :  { %v508_v58 = vpop.f32.mrf.mxu1  ;;  %v460_v11 = vadd.f32 %v459_v53, %v184_v21 }
  0xed   :  { %v509_v54 = vadd.f32 %v508_v58, %v480_v52 }
  0xf0   :  { %v537_v55 = vpop.f32.mrf.mxu2 }
  0xf1   :  { %v538_v56 = vadd.f32 %v537_v55, %v509_v54 }
  0xf3   :  { %551 = vst [vmem:[%s1250_s3 + $0x10] sm:$0xff] %v538_v56  ;;  %v482_v24 = vpop.f32.mrf.mxu3 }
  0xf4   :  { %v483_v59 = vadd.f32 %v482_v24, %v454_v57  ;;  %v511_v60 = vpop.f32.mrf.mxu1 }
  0xf6   :  { %v512_v61 = vadd.f32 %v511_v60, %v483_v59 }
  0xf8   :  { %v540_v62 = vpop.f32.mrf.mxu2 }
  0xf9   :  { %v541_v63 = vadd.f32 %v540_v62, %v512_v61 }
  0xfb   :  { %554 = vst [vmem:[%s1250_s3 + $0x28] sm:$0xff] %v541_v63  ;;  %v485_v1 = vpop.f32.mrf.mxu3 }
  0xfc   :  { %v486_v2 = vadd.f32 %v485_v1, %v457_v0  ;;  %v514_v5 = vpop.f32.mrf.mxu1 }
  0xfe   :  { %v515_v6 = vadd.f32 %v514_v5, %v486_v2 }
 0x100   :  { %v543_v8 = vpop.f32.mrf.mxu2 }
 0x101   :  { %v544_v9 = vadd.f32 %v543_v8, %v515_v6 }
 0x103   :  { %557 = vst [vmem:[%s1250_s3 + $0x40] sm:$0xff] %v544_v9  ;;  %v488_v12 = vpop.f32.mrf.mxu3 }
 0x104   :  { %v489_v13 = vadd.f32 %v488_v12, %v460_v11  ;;  %v517_v14 = vpop.f32.mrf.mxu1 }
 0x106   :  { %v518_v15 = vadd.f32 %v517_v14, %v489_v13 }
 0x108   :  { %v546_v16 = vpop.f32.mrf.mxu2 }
 0x109   :  { %v547_v17 = vadd.f32 %v546_v16, %v518_v15 }
 0x10b   :  { %560 = vst [vmem:[%s1250_s3 + $0x58] sm:$0xff] %v547_v17 }

</bundles_post_ra>
